<compile_context>
chip_gen: v5e
topology: v5e:2x2
jax: 0.10.0
libtpu: 0.0.40
codegen_flags: <defaults>
</compile_context>

<pallas_src>
import functools
import math

import jax
import jax.numpy as jnp
from jax.experimental import pallas as pl
from jax.experimental.pallas import tpu as pltpu


# ----------------------------- tiling helper -----------------------------

def _tile(dim, target, align):
    """Largest multiple of `align` that divides `dim` and is <= target, else the full dim."""
    if dim <= target:
        return dim
    t = (min(target, dim) // align) * align
    while t >= align:
        if dim % t == 0:
            return t
        t -= align
    return dim


# ----------------------------- kernels -----------------------------

def rmsnorm_matmul_kernel(x_ref, g_ref, w_ref, o_ref, *, eps):
    """Fused RMSNorm (f32) + projection (bf16 MXU, f32 accumulation)."""
    x = x_ref[...].astype(jnp.float32)                       # (tm, D)
    ms = jnp.mean(x * x, axis=-1, keepdims=True)
    xn = (x * jax.lax.rsqrt(ms + eps) * g_ref[...]).astype(jnp.bfloat16)
    o_ref[...] = jnp.dot(xn, w_ref[...],
                         preferred_element_type=jnp.float32).astype(o_ref.dtype)


def rope_kernel(x_ref, cos_ref, sin_ref, p_ref, o_ref):
    """Interleaved RoPE: out = x*cos + swap_pairs(x)*sin  (sign folded into sin table).

    swap_pairs is done with a tiny constant permutation matmul (exact for bf16 inputs).
    """
    xb = x_ref[0, 0]                                          # (tq, hd) bf16
    x = xb.astype(jnp.float32)
    xs = jnp.dot(xb, p_ref[...], preferred_element_type=jnp.float32)   # pair-swapped
    o_ref[0, 0] = (x * cos_ref[...] + xs * sin_ref[...]).astype(o_ref.dtype)


def flash_attn_kernel(q_ref, k_ref, v_ref, o_ref, m_ref, l_ref, acc_ref,
                      *, scale, tq, tk):
    """Flash attention with online softmax, in-kernel causal mask, GQA via index_map."""
    qi = pl.program_id(2)
    ki = pl.program_id(3)

    @pl.when(ki == 0)
    def _():
        m_ref[...] = jnp.full_like(m_ref, -jnp.inf)
        l_ref[...] = jnp.zeros_like(l_ref)
        acc_ref[...] = jnp.zeros_like(acc_ref)

    # Skip kv tiles that are entirely in the future of this q tile (causal).
    @pl.when(ki * tk < (qi + 1) * tq)
    def _():
        q = (q_ref[0, 0].astype(jnp.float32) * scale).astype(jnp.bfloat16)  # (tq, hd)
        k = k_ref[0, 0]                                                      # (tk, hd)
        s = jax.lax.dot_general(q, k, (((1,), (1,)), ((), ())),
                                preferred_element_type=jnp.float32)          # (tq, tk)
        q_pos = qi * tq + jax.lax.broadcasted_iota(jnp.int32, (tq, tk), 0)
        k_pos = ki * tk + jax.lax.broadcasted_iota(jnp.int32, (tq, tk), 1)
        s = jnp.where(k_pos <= q_pos, s, -1e30)

        m_prev = m_ref[...]
        m_new = jnp.maximum(m_prev, jnp.max(s, axis=-1, keepdims=True))
        alpha = jnp.exp(m_prev - m_new)
        p = jnp.exp(s - m_new)
        l_ref[...] = alpha * l_ref[...] + jnp.sum(p, axis=-1, keepdims=True)
        acc_ref[...] = alpha * acc_ref[...] + jnp.dot(
            p.astype(jnp.bfloat16), v_ref[0, 0], preferred_element_type=jnp.float32)
        m_ref[...] = m_new

    @pl.when(ki == pl.num_programs(3) - 1)
    def _():
        o_ref[0, 0] = (acc_ref[...] *
                       pl.reciprocal(l_ref[...], approx=True)).astype(o_ref.dtype)


def matmul_residual_kernel(x_ref, w_ref, res_ref, o_ref, acc_ref):
    """Tiled y = res + x @ w with K-axis reduction in an f32 accumulator."""
    k = pl.program_id(2)

    @pl.when(k == 0)
    def _():
        acc_ref[...] = res_ref[...].astype(jnp.float32)

    acc_ref[...] += jnp.dot(x_ref[...], w_ref[...], preferred_element_type=jnp.float32)

    @pl.when(k == pl.num_programs(2) - 1)
    def _():
        o_ref[...] = acc_ref[...].astype(o_ref.dtype)


def ffn_kernel(h_ref, g_ref, w1_ref, w3_ref, w2_ref, o_ref, acc_ref, *, eps):
    """Fused RMSNorm + SwiGLU FFN + residual, accumulated over hidden-dim (F) tiles."""
    j = pl.program_id(1)
    x = h_ref[...].astype(jnp.float32)                       # (tm, D)

    @pl.when(j == 0)
    def _():
        acc_ref[...] = x                                      # residual

    ms = jnp.mean(x * x, axis=-1, keepdims=True)
    xn = (x * jax.lax.rsqrt(ms + eps) * g_ref[...]).astype(jnp.bfloat16)
    a = jnp.dot(xn, w1_ref[...], preferred_element_type=jnp.float32)
    b = jnp.dot(xn, w3_ref[...], preferred_element_type=jnp.float32)
    hmid = (a * jax.nn.sigmoid(a) * b).astype(jnp.bfloat16)   # SiLU(a) * b
    acc_ref[...] += jnp.dot(hmid, w2_ref[...], preferred_element_type=jnp.float32)

    @pl.when(j == pl.num_programs(1) - 1)
    def _():
        o_ref[...] = acc_ref[...].astype(o_ref.dtype)


# ----------------------------- pallas_call wrappers -----------------------------

def fused_rmsnorm_matmul(x2d, gamma, w_t, eps, out_dtype=jnp.bfloat16):
    M, D = x2d.shape
    N = w_t.shape[1]
    tm = _tile(M, 256, 8)
    tn = _tile(N, 512, 128)
    return pl.pallas_call(
        functools.partial(rmsnorm_matmul_kernel, eps=eps),
        out_shape=jax.ShapeDtypeStruct((M, N), out_dtype),
        grid=(M // tm, N // tn),
        in_specs=[pl.BlockSpec((tm, D), lambda i, j: (i, 0)),
                  pl.BlockSpec((1, D), lambda i, j: (0, 0)),
                  pl.BlockSpec((D, tn), lambda i, j: (0, j))],
        out_specs=pl.BlockSpec((tm, tn), lambda i, j: (i, j)),
        compiler_params=pltpu.CompilerParams(
            dimension_semantics=("parallel", "parallel")),
    )(x2d, gamma.reshape(1, D), w_t)


def rope_apply(x4, cos_full, sin_signed, swap_mat):
    B, H, S, hd = x4.shape
    tq = _tile(S, 256, 8)
    blk = pl.BlockSpec((1, 1, tq, hd), lambda b, h, i: (b, h, i, 0))
    tab = pl.BlockSpec((tq, hd), lambda b, h, i: (i, 0))
    return pl.pallas_call(
        rope_kernel,
        out_shape=jax.ShapeDtypeStruct(x4.shape, x4.dtype),
        grid=(B, H, S // tq),
        in_specs=[blk, tab, tab, pl.BlockSpec((hd, hd), lambda b, h, i: (0, 0))],
        out_specs=blk,
        compiler_params=pltpu.CompilerParams(
            dimension_semantics=("parallel", "parallel", "parallel")),
    )(x4, cos_full, sin_signed, swap_mat)


def flash_attention(q, k, v, scale, n_rep):
    B, H, S, hd = q.shape
    tq = _tile(S, 128, 8)
    tk = _tile(S, 128, 8)
    q_spec = pl.BlockSpec((1, 1, tq, hd), lambda b, h, qi, ki: (b, h, qi, 0))
    kv_spec = pl.BlockSpec((1, 1, tk, hd), lambda b, h, qi, ki: (b, h // n_rep, ki, 0))
    o_spec = pl.BlockSpec((1, 1, tq, hd), lambda b, h, qi, ki: (b, h, qi, 0))
    return pl.pallas_call(
        functools.partial(flash_attn_kernel, scale=scale, tq=tq, tk=tk),
        out_shape=jax.ShapeDtypeStruct((B, H, S, hd), q.dtype),
        grid=(B, H, S // tq, S // tk),
        in_specs=[q_spec, kv_spec, kv_spec],
        out_specs=o_spec,
        scratch_shapes=[pltpu.VMEM((tq, 1), jnp.float32),
                        pltpu.VMEM((tq, 1), jnp.float32),
                        pltpu.VMEM((tq, hd), jnp.float32)],
        compiler_params=pltpu.CompilerParams(
            dimension_semantics=("parallel", "parallel", "parallel", "arbitrary")),
    )(q, k, v)


def matmul_residual(x2d, w_t, res2d, out_dtype=jnp.float32):
    M, K = x2d.shape
    N = w_t.shape[1]
    tm = _tile(M, 256, 8)
    tn = _tile(N, 512, 128)
    tk = _tile(K, 512, 128)
    return pl.pallas_call(
        matmul_residual_kernel,
        out_shape=jax.ShapeDtypeStruct((M, N), out_dtype),
        grid=(M // tm, N // tn, K // tk),
        in_specs=[pl.BlockSpec((tm, tk), lambda i, j, k: (i, k)),
                  pl.BlockSpec((tk, tn), lambda i, j, k: (k, j)),
                  pl.BlockSpec((tm, tn), lambda i, j, k: (i, j))],
        out_specs=pl.BlockSpec((tm, tn), lambda i, j, k: (i, j)),
        scratch_shapes=[pltpu.VMEM((tm, tn), jnp.float32)],
        compiler_params=pltpu.CompilerParams(
            dimension_semantics=("parallel", "parallel", "arbitrary")),
    )(x2d, w_t, res2d)


def fused_rmsnorm_swiglu(h2d, gamma, w1_t, w3_t, w2_t, eps):
    M, D = h2d.shape
    F = w1_t.shape[1]
    tm = _tile(M, 256, 8)
    tf = _tile(F, 512, 128)
    return pl.pallas_call(
        functools.partial(ffn_kernel, eps=eps),
        out_shape=jax.ShapeDtypeStruct((M, D), jnp.float32),
        grid=(M // tm, F // tf),
        in_specs=[pl.BlockSpec((tm, D), lambda i, j: (i, 0)),
                  pl.BlockSpec((1, D), lambda i, j: (0, 0)),
                  pl.BlockSpec((D, tf), lambda i, j: (0, j)),
                  pl.BlockSpec((D, tf), lambda i, j: (0, j)),
                  pl.BlockSpec((tf, D), lambda i, j: (j, 0))],
        out_specs=pl.BlockSpec((tm, D), lambda i, j: (i, 0)),
        scratch_shapes=[pltpu.VMEM((tm, D), jnp.float32)],
        compiler_params=pltpu.CompilerParams(
            dimension_semantics=("parallel", "arbitrary")),
    )(h2d, gamma.reshape(1, D), w1_t, w3_t, w2_t)


# ----------------------------- forward pass -----------------------------

def transformer_block_forward(x, params, cos, sin, n_heads, n_kv_heads):
    """x: (B, S, D) f32.  cos/sin: (S, hd//2) f32.  Returns (B, S, D) f32."""
    B, S, D = x.shape
    hd = D // n_heads
    n_rep = n_heads // n_kv_heads
    eps = params["eps"]
    M = B * S
    x_flat = x.reshape(M, D)

    # ---- attention branch ----
    # Fused RMSNorm + QKV projection -> bf16 activations.
    qkv = fused_rmsnorm_matmul(x_flat, params["attn_norm_w"], params["wqkv_t"], eps)
    q_dim = n_heads * hd
    kv_dim = n_kv_heads * hd
    xq = qkv[:, :q_dim].reshape(B, S, n_heads, hd).transpose(0, 2, 1, 3)          # (B,H,S,hd)
    xk = qkv[:, q_dim:q_dim + kv_dim].reshape(B, S, n_kv_heads, hd).transpose(0, 2, 1, 3)
    xv = qkv[:, q_dim + kv_dim:].reshape(B, S, n_kv_heads, hd).transpose(0, 2, 1, 3)

    # Small RoPE tables only: (S, hd), with the +/- sign folded into the sin table,
    # and a constant (hd, hd) pair-swap permutation matrix for the in-kernel swizzle.
    cos_full = jnp.repeat(cos, 2, axis=-1).astype(jnp.float32)                    # (S, hd)
    sign = jnp.tile(jnp.array([-1.0, 1.0], jnp.float32), hd // 2)
    sin_signed = jnp.repeat(sin, 2, axis=-1).astype(jnp.float32) * sign[None, :]  # (S, hd)
    idx = jnp.arange(hd, dtype=jnp.int32)
    swap_mat = (idx[:, None] == (idx[None, :] ^ 1)).astype(jnp.bfloat16)          # (hd, hd)

    xq = rope_apply(xq, cos_full, sin_signed, swap_mat)
    xk = rope_apply(xk, cos_full, sin_signed, swap_mat)

    # Flash attention; K/V stay at n_kv_heads (GQA via index_map), causal mask in-kernel.
    attn = flash_attention(xq, xk, xv, 1.0 / math.sqrt(hd), n_rep)                # (B,H,S,hd) bf16
    attn_flat = attn.transpose(0, 2, 1, 3).reshape(M, D)

    # wo projection + residual (tiled matmul with f32 accumulator).
    h = matmul_residual(attn_flat, params["wo_t"], x_flat)                        # (M, D) f32

    # ---- feed-forward branch (fused norm + SwiGLU + residual) ----
    out = fused_rmsnorm_swiglu(h, params["ffn_norm_w"], params["w1_t"],
                               params["w3_t"], params["w2_t"], eps)
    return out.reshape(B, S, D)


# ----------------------------- pure-JAX reference -----------------------------

def reference_block(x, params, cos, sin, n_heads, n_kv_heads):
    B, S, D = x.shape
    hd = D // n_heads
    n_rep = n_heads // n_kv_heads
    eps = params["eps"]
    f32 = jnp.float32

    def rms(t, w):
        tf = t.astype(f32)
        return tf * jax.lax.rsqrt(jnp.mean(tf * tf, -1, keepdims=True) + eps) * w

    wqkv = params["wqkv_t"].astype(f32)
    q_dim, kv_dim = n_heads * hd, n_kv_heads * hd
    hn = rms(x, params["attn_norm_w"])
    xq = (hn @ wqkv[:, :q_dim]).reshape(B, S, n_heads, hd)
    xk = (hn @ wqkv[:, q_dim:q_dim + kv_dim]).reshape(B, S, n_kv_heads, hd)
    xv = (hn @ wqkv[:, q_dim + kv_dim:]).reshape(B, S, n_kv_heads, hd)

    fc = cos + 1j * sin                                       # (S, hd//2)

    def rope(t):
        tr = t.reshape(*t.shape[:-1], -1, 2)
        tc = tr[..., 0] + 1j * tr[..., 1]
        o = tc * fc[None, :, None, :]
        return jnp.stack([o.real, o.imag], -1).reshape(t.shape)

    xq, xk = rope(xq), rope(xk)
    keys = jnp.repeat(xk, n_rep, axis=2)
    vals = jnp.repeat(xv, n_rep, axis=2)
    q = xq.transpose(0, 2, 1, 3)
    k = keys.transpose(0, 2, 1, 3)
    v = vals.transpose(0, 2, 1, 3)
    mask = jnp.where(jnp.triu(jnp.ones((S, S), jnp.bool_), k=1), -1e30, 0.0).astype(f32)
    scores = jnp.einsum("bhqd,bhkd->bhqk", q, k) / math.sqrt(hd) + mask[None, None]
    p = jax.nn.softmax(scores, axis=-1)
    o = jnp.einsum("bhqk,bhkd->bhqd", p, v).transpose(0, 2, 1, 3).reshape(B, S, D)
    h = x + o @ params["wo_t"].astype(f32)
    hn2 = rms(h, params["ffn_norm_w"])
    a = hn2 @ params["w1_t"].astype(f32)
    b = hn2 @ params["w3_t"].astype(f32)
    return h + (jax.nn.silu(a) * b) @ params["w2_t"].astype(f32)


# ----------------------------- main -----------------------------

if __name__ == "__main__":
    # Small ModelArgs-consistent shapes.
    B, S, D = 2, 8, 64
    n_heads, n_kv_heads = 4, 2
    hd = D // n_heads
    multiple_of = 32
    eps = 1e-5
    theta = 500000.0

    # FeedForward hidden dim exactly as in the PyTorch module.
    hidden = 4 * D
    hidden = int(2 * hidden / 3)
    hidden = multiple_of * ((hidden + multiple_of - 1) // multiple_of)   # -> 192

    key = jax.random.PRNGKey(0)
    keys = jax.random.split(key, 9)
    x = jax.random.normal(keys[0], (B, S, D), jnp.float32)

    scale = 0.02
    wq_t = scale * jax.random.normal(keys[1], (D, n_heads * hd), jnp.float32)
    wk_t = scale * jax.random.normal(keys[2], (D, n_kv_heads * hd), jnp.float32)
    wv_t = scale * jax.random.normal(keys[3], (D, n_kv_heads * hd), jnp.float32)
    wo_t = scale * jax.random.normal(keys[4], (n_heads * hd, D), jnp.float32)
    w1_t = scale * jax.random.normal(keys[5], (D, hidden), jnp.float32)
    w2_t = scale * jax.random.normal(keys[6], (hidden, D), jnp.float32)
    w3_t = scale * jax.random.normal(keys[7], (D, hidden), jnp.float32)
    attn_norm_w = jnp.ones((D,), jnp.float32) + 0.01 * jax.random.normal(keys[8], (D,), jnp.float32)
    ffn_norm_w = jnp.ones((D,), jnp.float32)

    # Weights stored in bf16 (MXU-native); norm weights stay f32.
    params = dict(
        eps=eps,
        wqkv_t=jnp.concatenate([wq_t, wk_t, wv_t], axis=1).astype(jnp.bfloat16),
        wo_t=wo_t.astype(jnp.bfloat16),
        w1_t=w1_t.astype(jnp.bfloat16),
        w2_t=w2_t.astype(jnp.bfloat16),
        w3_t=w3_t.astype(jnp.bfloat16),
        attn_norm_w=attn_norm_w,
        ffn_norm_w=ffn_norm_w,
    )

    # RoPE tables (freqs_cis) -- standard (unscaled) rope.
    freqs = 1.0 / (theta ** (jnp.arange(0, hd, 2, dtype=jnp.float32) / hd))   # (hd//2,)
    t = jnp.arange(S, dtype=jnp.float32)
    ang = jnp.outer(t, freqs)                                                 # (S, hd//2)
    cos, sin = jnp.cos(ang), jnp.sin(ang)

    out = transformer_block_forward(x, params, cos, sin, n_heads, n_kv_heads)
    out = jax.block_until_ready(out)

    ref = reference_block(x, params, cos, sin, n_heads, n_kv_heads)
    ref = jax.block_until_ready(ref)

    assert out.shape == (B, S, D)
    assert bool(jnp.all(jnp.isfinite(out)))
    assert bool(jnp.allclose(out, ref, rtol=2e-2, atol=2e-2)), "mismatch vs reference"

    print("KERNEL_OK")
</pallas_src>

<mosaic_0001>
module attributes {stable_mosaic.version = 11 : i64} {
  func.func @rmsnorm_matmul_kernel(%arg0: i32, %arg1: i32, %arg2: memref<16x64xf32, #tpu.memory_space<vmem>>, %arg3: memref<1x64xf32, #tpu.memory_space<vmem>>, %arg4: memref<64x128xbf16, #tpu.memory_space<vmem>>, %arg5: memref<16x128xbf16, #tpu.memory_space<vmem>>) attributes {dimension_semantics = [#tpu.dimension_semantics<parallel>, #tpu.dimension_semantics<parallel>], iteration_bounds = array<i64: 1, 1>, scalar_prefetch = 0 : i64, scratch_operands = 0 : i64, tpu.core_type = #tpu.core_type<tc>, window_params = [{transform_indices = @transform_0, window_bounds = array<i64: 16, 64>}, {pipeline_mode = #tpu.pipeline_mode<synchronous>, transform_indices = @transform_1, window_bounds = array<i64: 1, 64>}, {transform_indices = @transform_2, window_bounds = array<i64: 64, 128>}, {transform_indices = @transform_3, window_bounds = array<i64: 16, 128>}]} {
    %c0 = arith.constant 0 : index
    %c0_0 = arith.constant 0 : index
    %0 = vector.load %arg2[%c0, %c0_0] : memref<16x64xf32, #tpu.memory_space<vmem>>, vector<16x64xf32>
    %1 = arith.mulf %0, %0 : vector<16x64xf32>
    %cst = arith.constant dense<0.000000e+00> : vector<16xf32>
    %2 = vector.multi_reduction <add>, %1, %cst [1] : vector<16x64xf32> to vector<16xf32>
    %3 = vector.shape_cast %2 : vector<16xf32> to vector<16x1xf32>
    %cst_1 = arith.constant 6.400000e+01 : f32
    %4 = vector.broadcast %cst_1 : f32 to vector<16x1xf32>
    %5 = arith.divf %3, %4 : vector<16x1xf32>
    %cst_2 = arith.constant 9.99999974E-6 : f32
    %6 = vector.broadcast %cst_2 : f32 to vector<16x1xf32>
    %7 = arith.addf %5, %6 : vector<16x1xf32>
    %8 = math.rsqrt %7 : vector<16x1xf32>
    %9 = vector.broadcast %8 : vector<16x1xf32> to vector<16x64xf32>
    %10 = arith.mulf %0, %9 : vector<16x64xf32>
    %c0_3 = arith.constant 0 : index
    %c0_4 = arith.constant 0 : index
    %11 = vector.load %arg3[%c0_3, %c0_4] : memref<1x64xf32, #tpu.memory_space<vmem>>, vector<1x64xf32>
    %12 = vector.broadcast %11 : vector<1x64xf32> to vector<16x64xf32>
    %13 = arith.mulf %10, %12 : vector<16x64xf32>
    %14 = arith.truncf %13 : vector<16x64xf32> to vector<16x64xbf16>
    %c0_5 = arith.constant 0 : index
    %c0_6 = arith.constant 0 : index
    %15 = vector.load %arg4[%c0_5, %c0_6] : memref<64x128xbf16, #tpu.memory_space<vmem>>, vector<64x128xbf16>
    %cst_7 = arith.constant dense<0.000000e+00> : vector<16x128xf32>
    %16 = tpu.matmul %14, %15, %cst_7 {dimension_numbers = #tpu.dot_dimension_numbers<[1], [0], [0], [1], [0, 0, 1, 1], [], []>} : vector<16x64xbf16>, vector<64x128xbf16>, vector<16x128xf32> -> vector<16x128xf32>
    %17 = arith.truncf %16 : vector<16x128xf32> to vector<16x128xbf16>
    %c0_8 = arith.constant 0 : index
    %c0_9 = arith.constant 0 : index
    %18 = vector.load %arg5[%c0_8, %c0_9] : memref<16x128xbf16, #tpu.memory_space<vmem>>, vector<16x128xbf16>
    tpu.vector_store %arg5[%c0_8, %c0_9], %17 {strides = array<i32>} : memref<16x128xbf16, #tpu.memory_space<vmem>>, vector<16x128xbf16>,
    return
  }
  func.func @transform_0(%arg0: i32, %arg1: i32) -> (i32, i32) {
    %c0_i32 = arith.constant 0 : i32
    %c0_i32_0 = arith.constant 0 : i32
    return %arg0, %c0_i32 : i32, i32
  }
  func.func @transform_1(%arg0: i32, %arg1: i32) -> (i32, i32) {
    %c0_i32 = arith.constant 0 : i32
    %c0_i32_0 = arith.constant 0 : i32
    %c0_i32_1 = arith.constant 0 : i32
    return %c0_i32, %c0_i32_0 : i32, i32
  }
  func.func @transform_2(%arg0: i32, %arg1: i32) -> (i32, i32) {
    %c0_i32 = arith.constant 0 : i32
    %c0_i32_0 = arith.constant 0 : i32
    return %c0_i32, %arg1 : i32, i32
  }
  func.func @transform_3(%arg0: i32, %arg1: i32) -> (i32, i32) {
    %c0_i32 = arith.constant 0 : i32
    return %arg0, %arg1 : i32, i32
  }
}

</mosaic_0001>

<bundles_post_ra>
// kernel: tpu_custom_call.1
= control target key start
LH: loop header
LB: loop body
LE: loop exit
PB: predicated region body
PF: predicated region fallthrough
CT: control target
= control target key end

     0   :  { %8 = vsyncpa [#allocation3], 0  ;;  %s379_s0 = inlined_call_operand.hbm [shape: f32[16,64], index: 0, kind: input, shape index: {}]   ;;  %s380_s1 = inlined_call_operand.hbm [shape: f32[1,64], index: 1, kind: input, shape index: {}]   ;;  %s381_s2 = inlined_call_operand.hbm [shape: bf16[64,128], index: 2, kind: input, shape index: {}]   ;;  %s382_s3 = inlined_call_operand.hbm [shape: bf16[16,128], index: 3, kind: output, shape index: {}]  }
   0x1   :  { %9 = vsyncpa [#allocation6], 0  ;;  %s29_s14 = sshll.u32 %s380_s1, 4  ;;  %s30_s14 = int_to_ptr.hbm [resolvable:$true] %s29_s14 }
   0x2   :  { %10 = vsyncpa [#allocation4], 0  ;;  %s329_s15 = smov [#allocation5]   ;;  %s15_s19 = sshll.u32 %s379_s0, 4  ;;  %s16_s19 = int_to_ptr.hbm [resolvable:$true] %s15_s19 }
   0x3   :  { %s31_s16 = sshll.u32 %s329_s15, 4  ;;  %s330_s20 = smov [#allocation2]   ;;  %s32_s16 = int_to_ptr.vmem [resolvable:$true] %s31_s16 }
   0x4   :  { %34 = dma.hbm_to_vmem [thread:$0]  %s30_s14, 16, %s32_s16, [#allocation6]  }
   0x5   :  { %s17_s21 = sshll.u32 %s330_s20, 4  ;;  %s331_s22 = smov 128   ;;  %s18_s21 = int_to_ptr.vmem [resolvable:$true] %s17_s21 }
   0x6   :  { %s332_s23 = smov 8   ;;  %s39_s1 = sshll.u32 %s381_s2, 4  ;;  %s40_s1 = int_to_ptr.hbm [resolvable:$true] %s39_s1 }
   0x7   :  { %23 = dma.hbm_to_vmem [thread:$0]  %s16_s19, 256, %s18_s21, [#allocation3], %s331_s22, %s331_s22, %s332_s23  }
   0x8   :  { %s333_s26 = smov [#allocation7]   ;;  %s334_s28 = smov 64  }
   0x9   :  { %s41_s27 = sshll.u32 %s333_s26, 4  ;;  %s335_s29 = smov 4   ;;  %s42_s27 = int_to_ptr.vmem [resolvable:$true] %s41_s27 }
   0xa   :  { %47 = dma.hbm_to_vmem [thread:$0]  %s40_s1, 512, %s42_s27, [#allocation6], %s334_s28, %s334_s28, %s335_s29  }
   0xb   :  { %323 = dma.done.wait [#allocation3], 256  }
   0xc   :  { %324 = vsyncadd [#allocation3], 4294967040 }
   0xd   :  { %325 = dma.done.wait [#allocation6], 528  }
   0xe   :  { %326 = vsyncadd [#allocation6], 4294966768  ;;  %v61_v0 = vld [vmem:[#allocation2] sm:$0xff]  ;;  %vm65_vm0 = vcmask 523264   ;;  %v62_v2 = vld [vmem:[#allocation2 + $0x8] sm:$0xff]  ;;  %v336_v6 = vmov 64.0  }
   0xf   :  { %v63_v1 = vmul.f32 %v61_v0, %v61_v0  ;;  %v64_v4 = vmul.f32 %v62_v2, %v62_v2  ;;  %221 = vrcp.f32 %v336_v6  ;;  %v205_v10 = vld [vmem:[#allocation7 + $0x18] sm:$0xff]  ;;  %v204_v12 = vld [vmem:[#allocation7 + $0x10] sm:$0xff]  ;;  %v203_v14 = vld [vmem:[#allocation7 + $0x8] sm:$0xff]  ;;  %s337_s0 = smov [#allocation8]   ;;  %s171_s5 = sshll.u32 %s382_s3, 4  ;;  %s172_s5 = int_to_ptr.hbm [resolvable:$true] %s171_s5 }
  0x10   :  { %151 = vmatpush.bf16.msra.mxu0 %v205_v10  ;;  %v202_v16 = vld [vmem:[#allocation7] sm:$0xff]  ;;  %v220_v37 = vld [vmem:[#allocation5] ss:$0 sm:$0xff]  ;;  %s169_s2 = sshll.u32 %s337_s0, 4  ;;  %s170_s2 = int_to_ptr.vmem [resolvable:$true] %s169_s2 }
  0x11   :  { %v66_v3 = vsel %vm65_vm0, %v63_v1, 0.0  ;;  %v69_v5 = vsel %vm65_vm0, %v64_v4, 0.0 }
  0x12   :  { %67 = vadd.xlane.f32.xlu0 %v66_v3 }
  0x14   :  { %152 = vmatpush.bf16.msra.mxu0 %v204_v12 }
  0x15   :  { %v222_v7 = vpop.eup %221 }
  0x16   :  { %v73_v8 = vmul.f32 64.0, %v222_v7  ;;  %vm77_vm1 = vweird.f32 %v222_v7 }
  0x18   :  { %v74_v9 = vsub.f32 1.0, %v73_v8  ;;  %153 = vmatpush.bf16.msra.mxu0 %v203_v14 }
  0x1a   :  { %70 = vadd.xlane.f32.xlu0 %v69_v5  ;;  %v75_v11 = vmul.f32 %v222_v7, %v74_v9 }
  0x1c   :  { %v76_v13 = vadd.f32 %v222_v7, %v75_v11  ;;  %154 = vmatpush.bf16.msra.mxu0 %v202_v16 }
  0x1e   :  { %v78_v15 = vsel %vm77_vm1, %v222_v7, %v76_v13 }
  0x85   :  { %v68_v17 = vpop.xlane.xlu0 %67 }
  0x86   :  { %v79_v18 = vmul.f32 %v78_v15, %v68_v17 }
  0x88   :  { %v81_v19 = vadd.f32 1e-05, %v79_v18 }
  0x8a   :  { %223 = vrsqrt.f32 %v81_v19  ;;  %vm89_vm3 = vweird.f32 %v81_v19 }
  0x8d   :  { %v71_v20 = vpop.xlane.xlu0 %70 }
  0x8e   :  { %v80_v21 = vmul.f32 %v78_v15, %v71_v20 }
  0x90   :  { %v224_v22 = vpop.eup %223  ;;  %v82_v23 = vadd.f32 1e-05, %v80_v21 }
  0x91   :  { %v84_v24 = vmul.f32 %v224_v22, %v81_v19  ;;  %vm90_vm2 = vweird.f32 %v224_v22 }
  0x92   :  { %225 = vrsqrt.f32 %v82_v23  ;;  %vm91_vm4 = vmor %vm89_vm3, %vm90_vm2  ;;  %vm99_vm6 = vweird.f32 %v82_v23 }
  0x93   :  { %v85_v25 = vmul.f32 %v224_v22, %v84_v24 }
  0x95   :  { %v86_v26 = vmul.f32 0.5, %v85_v25 }
  0x97   :  { %v87_v27 = vsub.f32 1.5, %v86_v26 }
  0x98   :  { %v226_v28 = vpop.eup %225 }
  0x99   :  { %v94_v29 = vmul.f32 %v226_v28, %v82_v23  ;;  %v88_v30 = vmul.f32 %v224_v22, %v87_v27  ;;  %vm100_vm5 = vweird.f32 %v226_v28 }
  0x9a   :  { %vm101_vm7 = vmor %vm99_vm6, %vm100_vm5 }
  0x9b   :  { %v95_v31 = vmul.f32 %v226_v28, %v94_v29  ;;  %v92_v33 = vsel %vm91_vm4, %v224_v22, %v88_v30 }
  0x9c   :  { %v103_v36 = vmul.f32 %v92_v33, %v61_v0 }
  0x9d   :  { %v96_v32 = vmul.f32 0.5, %v95_v31 }
  0x9e   :  { %v109_v40 = vmul.f32 %v220_v37, %v103_v36 }
  0x9f   :  { %v97_v34 = vsub.f32 1.5, %v96_v32 }
  0xa1   :  { %v98_v35 = vmul.f32 %v226_v28, %v97_v34 }
  0xa3   :  { %v102_v38 = vsel %vm101_vm7, %v226_v28, %v98_v35 }
  0xa4   :  { %v104_v39 = vmul.f32 %v102_v38, %v62_v2 }
  0xa6   :  { %v110_v41 = vmul.f32 %v220_v37, %v104_v39 }
  0xa8   :  { %v111_v42 = vpack.c.bf16 %v110_v41, %v109_v40 }
  0xaa   :  { %201 = vmatmul.msk.bf16.vlgmr.msra.gmra.mxu0 %vm65_vm0, %v111_v42 }
 0x127   :  { %v156_v43 = vpop.f32.mrf.mxu0 }
 0x12f   :  { %v158_v44 = vpop.f32.mrf.mxu0 }
 0x130   :  { %v209_v45 = vpack.c.bf16 %v158_v44, %v156_v43 }
 0x132   :  { %210 = vst [vmem:[#allocation8] sm:$0xff] %v209_v45  }
 0x133   :  { %177 = dma.vmem_to_hbm [thread:$0]  %s170_s2, 128, %s172_s5, [#allocation4], %s334_s28, %s334_s28, %s335_s29  }
 0x134   :  { %327 = dma.done.wait [#allocation4], 128  }
 0x135   :  { %328 = vsyncadd [#allocation4], 4294967168 }
 0x136   :  { %182 = vsyncpa [#allocation3], 1 }
 0x137   :  { %183 = vsyncpa [#allocation6], 1 }
 0x138   :  { %184 = vsyncpa [#allocation4], 1 }

</bundles_post_ra>
